<compile_context>
chip_gen: v6e
topology: v6e:2x2x1
jax: 0.10.0
libtpu: 0.0.40
codegen_flags: <defaults>
</compile_context>

<pallas_src>
import functools

import jax
import jax.numpy as jnp
from jax import lax
from jax.experimental import pallas as pl
from jax.experimental.pallas import tpu as pltpu


# MXU-friendly dot_general dimension numbers.
_NATIVE = (((1,), (0,)), ((), ()))   # (M, K) x (K, N) -> contract K (MXU native)
_TRANS_B = (((1,), (1,)), ((), ()))  # (M, K) x (N, K) -> contract last dims


def _embedded_gaussian_attention_kernel(
    x_ref,      # (Bt, C, HW) f32 : channels on sublanes, pixels on lanes
    pw_ref,     # (2*Cp + Gp, C) bf16 : fused theta/phi/[g; ones] projection
    pb_ref,     # (2*Cp + Gp, 1) f32  : projection biases (+1.0 "ones" row)
    wgw_ref,    # (C, Gp) bf16        : fused W∘gamma (zero cols for pad rows)
    wgb_ref,    # (C, 1) f32
    out_ref,    # (Bt, C, HW) f32
    *, cint, cp,
):
    pw = pw_ref[...]
    pb = pb_ref[...]
    wgw = wgw_ref[...]
    wgb = wgb_ref[...]
    bt = x_ref.shape[0]

    def body(b, carry):
        x = x_ref[b]                                  # (C, HW) f32
        xb = x.astype(jnp.bfloat16)                   # bf16 MXU operands, f32 acc

        # Fused theta/phi/g 1x1 convs: ONE channel matmul, HW stays on lanes.
        # The g block carries an extra all-ones row (zero weights, bias 1.0)
        # whose aggregation output is the softmax denominator.
        proj = lax.dot_general(pw, xb, _NATIVE,
                               preferred_element_type=jnp.float32) + pb
        theta = proj[0:cp]                            # (Cp, HW) f32 (zero pad rows)
        phi = proj[cp:2 * cp]                         # (Cp, HW) f32
        g_ext = proj[2 * cp:]                         # (Gp, HW) f32, row cint == 1

        # Embedded-Gaussian affinity f[q, k] = <theta[:, q], phi[:, k]>.
        # Only the small (Cp, HW) theta tile is transposed (XLU); phi/g/x/out
        # never relayout.
        theta_q = jnp.transpose(theta).astype(jnp.bfloat16)      # (HW, Cp)
        f = lax.dot_general(theta_q, phi.astype(jnp.bfloat16), _NATIVE,
                            preferred_element_type=jnp.float32)  # (HW_q, HW_k)

        # Stable softmax with normalization deferred past the aggregation
        # matmul; exp directly in bf16 (p feeds the MXU in bf16 anyway).
        f = f - jnp.max(f, axis=-1, keepdims=True)
        p = jnp.exp(f.astype(jnp.bfloat16))                      # (HW, HW) bf16
        # TODO(synk): flash-style key-block tiling (online max / denom) once HW
        # grows past ~1-2K so the (HW, HW) slab stays inside v7x's 64 MiB VMEM.

        # y_ext[c, q] = sum_k g_ext[c, k] * p[q, k]; row `cint` is the softmax
        # denominator sum_k p[q, k] (free extra MXU output row).
        y_ext = lax.dot_general(g_ext.astype(jnp.bfloat16), p, _TRANS_B,
                                preferred_element_type=jnp.float32)  # (Gp, HW)

        # Deferred softmax normalization: O(Cint*HW) EUP/VPU work, not O(HW^2).
        inv = pl.reciprocal(y_ext[cint:cint + 1, :], approx=True)    # (1, HW)
        y = y_ext * inv                                              # (Gp, HW)

        # Fused W + gamma 1x1 convs (single matmul; pad columns are zero), then
        # the invertible-residual add.
        z = lax.dot_general(wgw, y.astype(jnp.bfloat16), _NATIVE,
                            preferred_element_type=jnp.float32) + wgb  # (C, HW)
        out_ref[b] = (x + z).astype(out_ref.dtype)
        return carry

    # fori_loop (not a traced Python loop) so per-image working sets are scoped.
    lax.fori_loop(0, bt, body, 0, unroll=True)


def squeeze2_nchw(x):
    """space-to-depth with block size 2 on an NCHW tensor."""
    # TODO(synk): fuse this space-to-depth into the kernel (strided sub-views of
    # the raw NCHW input) to drop the extra HBM read+write pass; also the repo's
    # `squeeze` class may interleave channels with a different fixed permutation.
    B, C, H, W = x.shape
    x = x.reshape(B, C, H // 2, 2, W // 2, 2)
    x = x.transpose(0, 1, 3, 5, 2, 4)
    return x.reshape(B, C * 4, H // 2, W // 2)


def _device_kind():
    try:
        return jax.devices()[0].device_kind.lower()
    except Exception:
        return ""


def _tile_plan(B, C, HW, device_kind=None):
    """Generation-aware batch tile + optional VMEM limit.

    v7x: 2 TensorCores, 64 MiB VMEM/TC -> keep >= 2 grid steps, tight budget.
    v5e/v6e: 1 TensorCore, 128 MiB VMEM -> as few grid steps as the budget
    allows (per-step pipeline overhead dominates at toy sizes).
    """
    kind = _device_kind() if device_kind is None else device_kind.lower()
    if "v7" in kind or "7x" in kind:
        num_tc, vmem_phys = 2, 64 << 20
    elif "v6" in kind or "v5e" in kind or "v5 lite" in kind or "v5lite" in kind:
        num_tc, vmem_phys = 1, 128 << 20
    else:
        num_tc, vmem_phys = 1, 64 << 20          # conservative for older/unknown gens
    budget = (vmem_phys * 3) // 5                # headroom for I/O buffers / regalloc

    # Per-image live set: f32 affinity + bf16 probabilities + projections + I/O.
    per_image = HW * HW * (4 + 2) + 32 * C * HW * 4
    bt = int(max(1, min(B, budget // max(per_image, 1))))
    if num_tc > 1:
        # keep >= num_tc grid steps so both v7x TensorCores get work
        while bt > 1 and -(-B // bt) < num_tc:
            bt -= 1
    while B % bt:
        bt -= 1

    need = bt * per_image + 4 * bt * C * HW * 4 + (1 << 20)
    vmem_limit = None
    if need > (24 << 20):                        # above default scoped limits
        vmem_limit = int(min(vmem_phys - (8 << 20), max(32 << 20, (need * 3) // 2)))
    return bt, vmem_limit


def attention_test_embedded_gaussian(x, params, batch_tile=None):
    """x: (B, Cin, H, W) NCHW float32. Returns (B, 4*Cin, H/2, W/2)."""
    xs = squeeze2_nchw(x)                        # (B, C, Hs, Ws), C = 4*Cin
    B, C, Hs, Ws = xs.shape
    HW = Hs * Ws
    x_seq = xs.reshape(B, C, HW)                 # channels-first; HW on the lane axis
    Cint = params["theta_w"].shape[1]
    Cp = -(-Cint // 8) * 8                       # theta/phi blocks, 8-sublane aligned
    Gp = -(-(Cint + 1) // 8) * 8                 # g block + ones (denominator) row

    auto_bt, vmem_limit = _tile_plan(B, C, HW)
    bt = auto_bt if batch_tile is None else batch_tile
    assert B % bt == 0, (B, bt)

    # Fused projection weights/biases, pre-transposed to (out_ch, in_ch) so every
    # in-kernel matmul is MXU-native with HW on lanes.  Pad rows are zero; the
    # g block gets an extra bias-only "ones" row that yields the softmax
    # denominator as a free MXU output row.
    f32 = jnp.float32
    pw = jnp.zeros((2 * Cp + Gp, C), f32)
    pw = pw.at[0:Cint].set(params["theta_w"].T)
    pw = pw.at[Cp:Cp + Cint].set(params["phi_w"].T)
    pw = pw.at[2 * Cp:2 * Cp + Cint].set(params["g_w"].T)
    pb = jnp.zeros((2 * Cp + Gp, 1), f32)
    pb = pb.at[0:Cint].set(params["theta_b"].reshape(Cint, 1))
    pb = pb.at[Cp:Cp + Cint].set(params["phi_b"].reshape(Cint, 1))
    pb = pb.at[2 * Cp:2 * Cp + Cint].set(params["g_b"].reshape(Cint, 1))
    pb = pb.at[2 * Cp + Cint, 0].set(1.0)        # ones row -> softmax denom on MXU

    # Fuse the back-to-back W and gamma 1x1 convs into a single linear map:
    #   z = (W_w @ gamma_w)^T y + (W_b @ gamma_w + gamma_b)^T
    wg = params["W_w"] @ params["gamma_w"]                      # (Cint, C)
    bg = params["W_b"] @ params["gamma_w"] + params["gamma_b"]  # (1, C)
    wgw = jnp.zeros((C, Gp), f32).at[:, 0:Cint].set(wg.T)       # zero cols for pad rows
    wgb = bg.reshape(C, 1).astype(f32)

    pw = pw.astype(jnp.bfloat16)
    wgw = wgw.astype(jnp.bfloat16)

    def full_spec(shape):
        nd = len(shape)
        return pl.BlockSpec(shape, lambda i, _nd=nd: (0,) * _nd)

    cp_kwargs = dict(dimension_semantics=("parallel",))
    if vmem_limit is not None:
        cp_kwargs["vmem_limit_bytes"] = vmem_limit

    kernel = functools.partial(_embedded_gaussian_attention_kernel,
                               cint=Cint, cp=Cp)

    out_seq = pl.pallas_call(
        kernel,
        out_shape=jax.ShapeDtypeStruct((B, C, HW), jnp.float32),
        grid=(B // bt,),
        in_specs=[
            pl.BlockSpec((bt, C, HW), lambda i: (i, 0, 0)),
            full_spec((2 * Cp + Gp, C)),
            full_spec((2 * Cp + Gp, 1)),
            full_spec((C, Gp)),
            full_spec((C, 1)),
        ],
        out_specs=pl.BlockSpec((bt, C, HW), lambda i: (i, 0, 0)),
        compiler_params=pltpu.CompilerParams(**cp_kwargs),
    )(x_seq, pw, pb, wgw, wgb)

    return out_seq.reshape(B, C, Hs, Ws)


def make_params(key, C, Cint, scale=0.1):
    ks = jax.random.split(key, 10)
    init = lambda k, shp: scale * jax.random.normal(k, shp, jnp.float32)
    return {
        "theta_w": init(ks[0], (C, Cint)), "theta_b": init(ks[1], (1, Cint)),
        "phi_w":   init(ks[2], (C, Cint)), "phi_b":   init(ks[3], (1, Cint)),
        "g_w":     init(ks[4], (C, Cint)), "g_b":     init(ks[5], (1, Cint)),
        "W_w":     init(ks[6], (Cint, C)), "W_b":     init(ks[7], (1, C)),
        "gamma_w": init(ks[8], (C, C)),    "gamma_b": init(ks[9], (1, C)),
    }


def _reference_forward(x, params):
    """Pure-JAX f32 reference with the original (unfused) op order."""
    xs = squeeze2_nchw(x)
    B, C, Hs, Ws = xs.shape
    HW = Hs * Ws
    xq = xs.reshape(B, C, HW).transpose(0, 2, 1)            # (B, HW, C)
    theta = xq @ params["theta_w"] + params["theta_b"]
    phi = xq @ params["phi_w"] + params["phi_b"]
    g = xq @ params["g_w"] + params["g_b"]
    f = jax.nn.softmax(jnp.einsum("bqi,bki->bqk", theta, phi), axis=-1)
    y = jnp.einsum("bqk,bki->bqi", f, g)
    wy = y @ params["W_w"] + params["W_b"]
    z = wy @ params["gamma_w"] + params["gamma_b"]
    out = xq + z
    return out.transpose(0, 2, 1).reshape(B, C, Hs, Ws)


if __name__ == "__main__":
    key = jax.random.PRNGKey(0)
    kx, kp = jax.random.split(key)

    # attention layer was built with 12 channels => pre-squeeze input has 3.
    B, Cin, H, W = 2, 3, 16, 16
    C, Cint = 4 * Cin, (4 * Cin) // 2          # 12, 6

    x = jax.random.normal(kx, (B, Cin, H, W), jnp.float32)
    params = make_params(kp, C, Cint)

    out = attention_test_embedded_gaussian(x, params)
    out = jax.block_until_ready(out)

    assert out.shape == (B, C, H // 2, W // 2), out.shape
    assert jnp.isfinite(out).all()

    ref = _reference_forward(x, params)
    max_err = float(jnp.max(jnp.abs(out - ref)))
    assert max_err < 5e-2, f"mismatch vs reference: {max_err}"

    print("KERNEL_OK")
</pallas_src>

<mosaic_0001>
module attributes {stable_mosaic.version = 11 : i64} {
  func.func @_embedded_gaussian_attention_kernel(%arg0: i32, %arg1: memref<2x12x64xf32, #tpu.memory_space<vmem>>, %arg2: memref<24x12xbf16, #tpu.memory_space<vmem>>, %arg3: memref<24x1xf32, #tpu.memory_space<vmem>>, %arg4: memref<12x8xbf16, #tpu.memory_space<vmem>>, %arg5: memref<12x1xf32, #tpu.memory_space<vmem>>, %arg6: memref<2x12x64xf32, #tpu.memory_space<vmem>>) attributes {dimension_semantics = [#tpu.dimension_semantics<parallel>], iteration_bounds = array<i64: 1>, scalar_prefetch = 0 : i64, scratch_operands = 0 : i64, tpu.core_type = #tpu.core_type<tc>, window_params = [{transform_indices = @transform_0, window_bounds = array<i64: 2, 12, 64>}, {pipeline_mode = #tpu.pipeline_mode<synchronous>, transform_indices = @transform_1, window_bounds = array<i64: 24, 12>}, {pipeline_mode = #tpu.pipeline_mode<synchronous>, transform_indices = @transform_2, window_bounds = array<i64: 24, 1>}, {pipeline_mode = #tpu.pipeline_mode<synchronous>, transform_indices = @transform_3, window_bounds = array<i64: 12, 8>}, {pipeline_mode = #tpu.pipeline_mode<synchronous>, transform_indices = @transform_4, window_bounds = array<i64: 12, 1>}, {transform_indices = @transform_5, window_bounds = array<i64: 2, 12, 64>}]} {
    %c0 = arith.constant 0 : index
    %c0_0 = arith.constant 0 : index
    %0 = vector.load %arg2[%c0, %c0_0] : memref<24x12xbf16, #tpu.memory_space<vmem>>, vector<24x12xbf16>
    %c0_1 = arith.constant 0 : index
    %c0_2 = arith.constant 0 : index
    %1 = vector.load %arg3[%c0_1, %c0_2] : memref<24x1xf32, #tpu.memory_space<vmem>>, vector<24x1xf32>
    %c0_3 = arith.constant 0 : index
    %c0_4 = arith.constant 0 : index
    %2 = vector.load %arg4[%c0_3, %c0_4] : memref<12x8xbf16, #tpu.memory_space<vmem>>, vector<12x8xbf16>
    %c0_5 = arith.constant 0 : index
    %c0_6 = arith.constant 0 : index
    %3 = vector.load %arg5[%c0_5, %c0_6] : memref<12x1xf32, #tpu.memory_space<vmem>>, vector<12x1xf32>
    %c0_i32 = arith.constant 0 : i32
    %4 = arith.index_cast %c0_i32 : i32 to index
    %c0_7 = arith.constant 0 : index
    %c0_8 = arith.constant 0 : index
    %5 = vector.load %arg1[%4, %c0_7, %c0_8] : memref<2x12x64xf32, #tpu.memory_space<vmem>>, vector<1x12x64xf32>
    %6 = vector.shape_cast %5 : vector<1x12x64xf32> to vector<12x64xf32>
    %7 = arith.truncf %6 : vector<12x64xf32> to vector<12x64xbf16>
    %cst = arith.constant dense<0.000000e+00> : vector<24x64xf32>
    %8 = tpu.matmul %0, %7, %cst {dimension_numbers = #tpu.dot_dimension_numbers<[1], [0], [0], [1], [0, 0, 1, 1], [], []>} : vector<24x12xbf16>, vector<12x64xbf16>, vector<24x64xf32> -> vector<24x64xf32>
    %9 = vector.broadcast %1 : vector<24x1xf32> to vector<24x64xf32>
    %10 = arith.addf %8, %9 : vector<24x64xf32>
    %11 = vector.extract_strided_slice %10 {offsets = [0, 0], sizes = [8, 64], strides = [1, 1]} : vector<24x64xf32> to vector<8x64xf32>
    %12 = vector.extract_strided_slice %10 {offsets = [8, 0], sizes = [8, 64], strides = [1, 1]} : vector<24x64xf32> to vector<8x64xf32>
    %13 = vector.extract_strided_slice %10 {offsets = [16, 0], sizes = [8, 64], strides = [1, 1]} : vector<24x64xf32> to vector<8x64xf32>
    %14 = tpu.transpose %11, [1, 0] : vector<8x64xf32> -> vector<64x8xf32>
    %15 = arith.truncf %14 : vector<64x8xf32> to vector<64x8xbf16>
    %16 = arith.truncf %12 : vector<8x64xf32> to vector<8x64xbf16>
    %cst_9 = arith.constant dense<0.000000e+00> : vector<64x64xf32>
    %17 = tpu.matmul %15, %16, %cst_9 {dimension_numbers = #tpu.dot_dimension_numbers<[1], [0], [0], [1], [0, 0, 1, 1], [], []>} : vector<64x8xbf16>, vector<8x64xbf16>, vector<64x64xf32> -> vector<64x64xf32>
    %cst_10 = arith.constant dense<0xFF800000> : vector<64xf32>
    %18 = vector.multi_reduction <maximumf>, %17, %cst_10 [1] : vector<64x64xf32> to vector<64xf32>
    %19 = vector.shape_cast %18 : vector<64xf32> to vector<64x1xf32>
    %20 = vector.broadcast %19 : vector<64x1xf32> to vector<64x64xf32>
    %21 = arith.subf %17, %20 : vector<64x64xf32>
    %22 = arith.truncf %21 : vector<64x64xf32> to vector<64x64xbf16>
    %23 = math.exp %22 : vector<64x64xbf16>
    %24 = arith.truncf %13 : vector<8x64xf32> to vector<8x64xbf16>
    %cst_11 = arith.constant dense<0.000000e+00> : vector<8x64xf32>
    %25 = tpu.matmul %24, %23, %cst_11 {dimension_numbers = #tpu.dot_dimension_numbers<[1], [1], [0], [0], [0, 0, 1, 0], [], []>} : vector<8x64xbf16>, vector<64x64xbf16>, vector<8x64xf32> -> vector<8x64xf32>
    %26 = vector.extract_strided_slice %25 {offsets = [6, 0], sizes = [1, 64], strides = [1, 1]} : vector<8x64xf32> to vector<1x64xf32>
    %27 = tpu.reciprocal %26 {approx = true} : vector<1x64xf32> -> vector<1x64xf32>
    %28 = vector.broadcast %27 : vector<1x64xf32> to vector<8x64xf32>
    %29 = arith.mulf %25, %28 : vector<8x64xf32>
    %30 = arith.truncf %29 : vector<8x64xf32> to vector<8x64xbf16>
    %cst_12 = arith.constant dense<0.000000e+00> : vector<12x64xf32>
    %31 = tpu.matmul %2, %30, %cst_12 {dimension_numbers = #tpu.dot_dimension_numbers<[1], [0], [0], [1], [0, 0, 1, 1], [], []>} : vector<12x8xbf16>, vector<8x64xbf16>, vector<12x64xf32> -> vector<12x64xf32>
    %32 = vector.broadcast %3 : vector<12x1xf32> to vector<12x64xf32>
    %33 = arith.addf %31, %32 : vector<12x64xf32>
    %34 = arith.addf %6, %33 : vector<12x64xf32>
    %35 = arith.index_cast %c0_i32 : i32 to index
    %c0_13 = arith.constant 0 : index
    %c0_14 = arith.constant 0 : index
    %36 = vector.load %arg6[%35, %c0_13, %c0_14] : memref<2x12x64xf32, #tpu.memory_space<vmem>>, vector<1x12x64xf32>
    %37 = vector.shape_cast %36 : vector<1x12x64xf32> to vector<12x64xf32>
    %38 = vector.shape_cast %34 : vector<12x64xf32> to vector<1x12x64xf32>
    tpu.vector_store %arg6[%35, %c0_13, %c0_14], %38 {strides = array<i32>} : memref<2x12x64xf32, #tpu.memory_space<vmem>>, vector<1x12x64xf32>,
    %c1_i32 = arith.constant 1 : i32
    %39 = arith.index_cast %c1_i32 : i32 to index
    %c0_15 = arith.constant 0 : index
    %c0_16 = arith.constant 0 : index
    %40 = vector.load %arg1[%39, %c0_15, %c0_16] : memref<2x12x64xf32, #tpu.memory_space<vmem>>, vector<1x12x64xf32>
    %41 = vector.shape_cast %40 : vector<1x12x64xf32> to vector<12x64xf32>
    %42 = arith.truncf %41 : vector<12x64xf32> to vector<12x64xbf16>
    %cst_17 = arith.constant dense<0.000000e+00> : vector<24x64xf32>
    %43 = tpu.matmul %0, %42, %cst_17 {dimension_numbers = #tpu.dot_dimension_numbers<[1], [0], [0], [1], [0, 0, 1, 1], [], []>} : vector<24x12xbf16>, vector<12x64xbf16>, vector<24x64xf32> -> vector<24x64xf32>
    %44 = vector.broadcast %1 : vector<24x1xf32> to vector<24x64xf32>
    %45 = arith.addf %43, %44 : vector<24x64xf32>
    %46 = vector.extract_strided_slice %45 {offsets = [0, 0], sizes = [8, 64], strides = [1, 1]} : vector<24x64xf32> to vector<8x64xf32>
    %47 = vector.extract_strided_slice %45 {offsets = [8, 0], sizes = [8, 64], strides = [1, 1]} : vector<24x64xf32> to vector<8x64xf32>
    %48 = vector.extract_strided_slice %45 {offsets = [16, 0], sizes = [8, 64], strides = [1, 1]} : vector<24x64xf32> to vector<8x64xf32>
    %49 = tpu.transpose %46, [1, 0] : vector<8x64xf32> -> vector<64x8xf32>
    %50 = arith.truncf %49 : vector<64x8xf32> to vector<64x8xbf16>
    %51 = arith.truncf %47 : vector<8x64xf32> to vector<8x64xbf16>
    %cst_18 = arith.constant dense<0.000000e+00> : vector<64x64xf32>
    %52 = tpu.matmul %50, %51, %cst_18 {dimension_numbers = #tpu.dot_dimension_numbers<[1], [0], [0], [1], [0, 0, 1, 1], [], []>} : vector<64x8xbf16>, vector<8x64xbf16>, vector<64x64xf32> -> vector<64x64xf32>
    %cst_19 = arith.constant dense<0xFF800000> : vector<64xf32>
    %53 = vector.multi_reduction <maximumf>, %52, %cst_19 [1] : vector<64x64xf32> to vector<64xf32>
    %54 = vector.shape_cast %53 : vector<64xf32> to vector<64x1xf32>
    %55 = vector.broadcast %54 : vector<64x1xf32> to vector<64x64xf32>
    %56 = arith.subf %52, %55 : vector<64x64xf32>
    %57 = arith.truncf %56 : vector<64x64xf32> to vector<64x64xbf16>
    %58 = math.exp %57 : vector<64x64xbf16>
    %59 = arith.truncf %48 : vector<8x64xf32> to vector<8x64xbf16>
    %cst_20 = arith.constant dense<0.000000e+00> : vector<8x64xf32>
    %60 = tpu.matmul %59, %58, %cst_20 {dimension_numbers = #tpu.dot_dimension_numbers<[1], [1], [0], [0], [0, 0, 1, 0], [], []>} : vector<8x64xbf16>, vector<64x64xbf16>, vector<8x64xf32> -> vector<8x64xf32>
    %61 = vector.extract_strided_slice %60 {offsets = [6, 0], sizes = [1, 64], strides = [1, 1]} : vector<8x64xf32> to vector<1x64xf32>
    %62 = tpu.reciprocal %61 {approx = true} : vector<1x64xf32> -> vector<1x64xf32>
    %63 = vector.broadcast %62 : vector<1x64xf32> to vector<8x64xf32>
    %64 = arith.mulf %60, %63 : vector<8x64xf32>
    %65 = arith.truncf %64 : vector<8x64xf32> to vector<8x64xbf16>
    %cst_21 = arith.constant dense<0.000000e+00> : vector<12x64xf32>
    %66 = tpu.matmul %2, %65, %cst_21 {dimension_numbers = #tpu.dot_dimension_numbers<[1], [0], [0], [1], [0, 0, 1, 1], [], []>} : vector<12x8xbf16>, vector<8x64xbf16>, vector<12x64xf32> -> vector<12x64xf32>
    %67 = vector.broadcast %3 : vector<12x1xf32> to vector<12x64xf32>
    %68 = arith.addf %66, %67 : vector<12x64xf32>
    %69 = arith.addf %41, %68 : vector<12x64xf32>
    %70 = arith.index_cast %c1_i32 : i32 to index
    %c0_22 = arith.constant 0 : index
    %c0_23 = arith.constant 0 : index
    %71 = vector.load %arg6[%70, %c0_22, %c0_23] : memref<2x12x64xf32, #tpu.memory_space<vmem>>, vector<1x12x64xf32>
    %72 = vector.shape_cast %71 : vector<1x12x64xf32> to vector<12x64xf32>
    %73 = vector.shape_cast %69 : vector<12x64xf32> to vector<1x12x64xf32>
    tpu.vector_store %arg6[%70, %c0_22, %c0_23], %73 {strides = array<i32>} : memref<2x12x64xf32, #tpu.memory_space<vmem>>, vector<1x12x64xf32>,
    %c2_i32 = arith.constant 2 : i32
    return
  }
  func.func @transform_0(%arg0: i32) -> (i32, i32, i32) {
    %c0_i32 = arith.constant 0 : i32
    %c0_i32_0 = arith.constant 0 : i32
    %c0_i32_1 = arith.constant 0 : i32
    return %arg0, %c0_i32, %c0_i32_0 : i32, i32, i32
  }
  func.func @transform_1(%arg0: i32) -> (i32, i32) {
    %c0_i32 = arith.constant 0 : i32
    %c0_i32_0 = arith.constant 0 : i32
    %c0_i32_1 = arith.constant 0 : i32
    return %c0_i32, %c0_i32_0 : i32, i32
  }
  func.func @transform_2(%arg0: i32) -> (i32, i32) {
    %c0_i32 = arith.constant 0 : i32
    %c0_i32_0 = arith.constant 0 : i32
    %c0_i32_1 = arith.constant 0 : i32
    return %c0_i32, %c0_i32_0 : i32, i32
  }
  func.func @transform_3(%arg0: i32) -> (i32, i32) {
    %c0_i32 = arith.constant 0 : i32
    %c0_i32_0 = arith.constant 0 : i32
    %c0_i32_1 = arith.constant 0 : i32
    return %c0_i32, %c0_i32_0 : i32, i32
  }
  func.func @transform_4(%arg0: i32) -> (i32, i32) {
    %c0_i32 = arith.constant 0 : i32
    %c0_i32_0 = arith.constant 0 : i32
    %c0_i32_1 = arith.constant 0 : i32
    return %c0_i32, %c0_i32_0 : i32, i32
  }
  func.func @transform_5(%arg0: i32) -> (i32, i32, i32) {
    %c0_i32 = arith.constant 0 : i32
    %c0_i32_0 = arith.constant 0 : i32
    %c0_i32_1 = arith.constant 0 : i32
    return %arg0, %c0_i32, %c0_i32_0 : i32, i32, i32
  }
}

</mosaic_0001>

<bundles_post_ra>
// kernel: tpu_custom_call.1
= control target key start
LH: loop header
LB: loop body
LE: loop exit
PB: predicated region body
PF: predicated region fallthrough
CT: control target
= control target key end

     0   :  { %vm64_vm0 = vcmask 1045504   ;;  %vm57_vm1 = vcmask 97280   ;;  %v902_v2 = vmov 0   ;;  %vm166_vm2 = vcmask 1043456   ;;  %s1114_s0 = inlined_call_operand.vmem [shape: f32[2,12,64], index: 0, kind: input, shape index: {}]   ;;  %s1115_s1 = inlined_call_operand.vmem [shape: bf16[24,12], index: 1, kind: input, shape index: {}]   ;;  %s1116_s2 = inlined_call_operand.vmem [shape: f32[24,1], index: 2, kind: input, shape index: {}]   ;;  %s1117_s3 = inlined_call_operand.vmem [shape: bf16[12,8], index: 3, kind: input, shape index: {}]   ;;  %s1118_s4 = inlined_call_operand.vmem [shape: f32[12,1], index: 4, kind: input, shape index: {}]   ;;  %s1119_s5 = inlined_call_operand.vmem [shape: f32[2,12,64], index: 5, kind: output, shape index: {}]  }
   0x1   :  { %v938_v0 = vld [vmem:[%s1114_s0] sm:$0xff]  ;;  %v943_v1 = vld [vmem:[%s1114_s0 + $0x8] sm:$0xf]  ;;  %878 = vset.pattern.permute.xlu0 %v902_v2  ;;  %vm153_vm3 = vcmask 64512   ;;  %vm235_vm4 = vcmask 523264   ;;  %v903_v47 = vmov 0.0  }
   0x2   :  { %v33_v3 = vpack.c.bf16 %v943_v1, %v938_v0  ;;  %v950_v4 = vld [vmem:[%s1115_s1] sm:$0xff]   ;;  %v960_v7 = vld [vmem:[%s1115_s1 + $0x8] ss:$0 sps:$4 sm:$0xff]   ;;  %819 = vmatprep.subr.bf16.mxu0 %v903_v47  ;;  %v26_v48 = vld [vmem:[%s1116_s2 + $0x10] sm:$0xff]  ;;  %vm904_vm5 = vmmov 0   ;;  %vm412_vm6 = vcmask 519168  }
   0x3   :  { %v24_v5 = vld [vmem:[%s1116_s2] sm:$0xff]  ;;  %805 = vmatprep.mubr.msk.bf16.mxu1 %vm57_vm1, %v950_v4  ;;  %v25_v8 = vld [vmem:[%s1116_s2 + $0x8] sm:$0xff]  ;;  %827 = vmatprep.mubr.msk.bf16.mxu0 %vm904_vm5, %v903_v47 }
   0x4   :  { %871 = vmatprep.subr.msk.bf16.mxu1 %vm64_vm0, %v33_v3  ;;  %v66_v6 = vsel %vm64_vm0, %v33_v3, 0  ;;  %36 = vperm.xlu0 %878, %v24_v5  }
   0x5   :  { %804 = vmatpush3.bf16.msra.mxu1 %v66_v6 }
   0x8   :  { %806 = vmatmul.mubr.msk.bf16.vlgmr.msra.gmra.mxu1 %vm57_vm1, %v960_v7  ;;  %41 = vperm.xlu0 %878, %v25_v8  }
  0x7f   :  { %v969_v9 = vpop.permute.xlu0 %36 }
  0x83   :  { %v974_v14 = vpop.permute.xlu0 %41 }
  0xc8   :  { %v971_v10 = vpop.f32.mrf.mxu1 }
  0xca   :  { %v102_v11 = vpop.f32.mrf.mxu1 }
  0xcb   :  { %v103_v12 = vadd.f32 %v102_v11, %v969_v9 }
  0xcc   :  { %v808_v13 = vpop.f32.mrf.mxu1 }
  0xcd   :  { %116 = vxpose.xlu1.b32.start.end [1/1] (short) (narrow) %v103_v12, 64 }
  0xce   :  { %v105_v15 = vpop.f32.mrf.mxu1 }
  0xcf   :  { %v106_v16 = vadd.f32 %v105_v15, %v974_v14 }
  0xd1   :  { %v152_v17 = vpack.c.bf16 %v106_v16, %v106_v16 }
  0xd3   :  { %v168_v18 = vsel %vm166_vm2, %v152_v17, 0  ;;  %872 = vmatprep.subr.msk.bf16.mxu1 %vm166_vm2, %v152_v17 }
  0xd4   :  { %810 = vmatpush3.bf16.msra.mxu1 %v168_v18 }
  0xd5   :  { %831 = vmatprep.subr.bf16.mxu1 %v903_v47 }
 0x149   :  { %v132_v19 = vpop.trf.xlu1 }
 0x14d   :  { %v133_v20 = vpop.trf.xlu1 }
 0x14e   :  { %v148_v21 = vpack.c.bf16 %v133_v20, %v132_v19 }
 0x150   :  { %811 = vmatprep.mubr.msk.bf16.mxu1 %vm153_vm3, %v148_v21 }
 0x151   :  { %v134_v22 = vpop.trf.xlu1 }
 0x155   :  { %v135_v23 = vpop.trf.xlu1 }
 0x156   :  { %v149_v24 = vpack.c.bf16 %v135_v23, %v134_v22 }
 0x158   :  { %812 = vmatmul.mubr.msk.bf16.vlgmr.msra.gmra.mxu1 %vm153_vm3, %v149_v24 }
 0x159   :  { %v136_v25 = vpop.trf.xlu1 }
 0x15d   :  { %v137_v26 = vpop.trf.xlu1 }
 0x15e   :  { %v150_v27 = vpack.c.bf16 %v137_v26, %v136_v25 }
 0x160   :  { %815 = vmatprep.mubr.msk.bf16.mxu1 %vm153_vm3, %v150_v27 }
 0x161   :  { %v138_v28 = vpop.trf.xlu1 }
 0x165   :  { %v139_v29 = vpop.trf.xlu1 }
 0x166   :  { %v151_v30 = vpack.c.bf16 %v139_v29, %v138_v28  ;;  %v341_v29 = vlaneseq }
 0x168   :  { %816 = vmatmul.mubr.msk.bf16.gmra.mxu1 %vm153_vm3, %v151_v30 }
 0x169   :  { %833 = vmatprep.mubr.msk.bf16.mxu1 %vm904_vm5, %v903_v47 }
 0x218   :  { %v813_v31 = vpop.f32.mrf.mxu1 }
 0x219   :  { %v242_v43 = vsel %vm235_vm4, %v813_v31, -inf }
 0x21a   :  { %v204_v32 = vpop.f32.mrf.mxu1 }
 0x21b   :  { %v236_v45 = vsel %vm235_vm4, %v204_v32, -inf }
 0x21c   :  { %v814_v33 = vpop.f32.mrf.mxu1 }
 0x21d   :  { %v245_v44 = vsel %vm235_vm4, %v814_v33, -inf }
 0x21e   :  { %v207_v34 = vpop.f32.mrf.mxu1 }
 0x21f   :  { %v239_v46 = vsel %vm235_vm4, %v207_v34, -inf }
 0x228   :  { %v817_v35 = vpop.f32.mrf.mxu1 }
 0x229   :  { %v254_v36 = vsel %vm235_vm4, %v817_v35, -inf }
 0x22a   :  { %255 = vmax.xlane.f32.xlu1 %v254_v36  ;;  %v220_v37 = vpop.f32.mrf.mxu1  ;;  %v1028_v36 = vld [vmem:[%s1114_s0 + $0x18] sm:$0xf] }
 0x22b   :  { %v248_v40 = vsel %vm235_vm4, %v220_v37, -inf }
 0x22c   :  { %v818_v38 = vpop.f32.mrf.mxu1 }
 0x22d   :  { %v257_v39 = vsel %vm235_vm4, %v818_v38, -inf }
 0x22e   :  { %258 = vmax.xlane.f32.xlu0 %v257_v39  ;;  %v223_v41 = vpop.f32.mrf.mxu1 }
 0x22f   :  { %v251_v42 = vsel %vm235_vm4, %v223_v41, -inf }
 0x232   :  { %249 = vmax.xlane.f32.xlu0 %v248_v40 }
 0x236   :  { %252 = vmax.xlane.f32.xlu0 %v251_v42 }
 0x23a   :  { %243 = vmax.xlane.f32.xlu0 %v242_v43 }
 0x23e   :  { %246 = vmax.xlane.f32.xlu0 %v245_v44 }
 0x242   :  { %237 = vmax.xlane.f32.xlu0 %v236_v45 }
 0x246   :  { %240 = vmax.xlane.f32.xlu0 %v239_v46 }
 0x25c   :  { %46 = vperm.xlu0 %878, %v26_v48  }
 0x2b3   :  { %v256_v49 = vpop.xlane.xlu1 %255 }
 0x2b4   :  { %v266_v51 = vsub.f32 %v817_v35, %v256_v49  ;;  %v1023_v35 = vld [vmem:[%s1114_s0 + $0x10] sm:$0xff] }
 0x2b5   :  { %v417_v39 = vpack.c.bf16 %v1028_v36, %v1023_v35 }
 0x2b7   :  { %v259_v50 = vpop.xlane.xlu0 %258  ;;  %v419_v42 = vsel %vm64_vm0, %v417_v39, 0 }
 0x2b8   :  { %v267_v52 = vsub.f32 %v818_v38, %v259_v50 }
 0x2ba   :  { %v271_v53 = vpack.c.bf16 %v267_v52, %v266_v51 }
 0x2bb   :  { %v250_v54 = vpop.xlane.xlu0 %249 }
 0x2bc   :  { %v282_v55 = vmul.bf16 1069105081, %v271_v53  ;;  %v264_v57 = vsub.f32 %v220_v37, %v250_v54 }
 0x2be   :  { %882 = vpow.bf16 %v282_v55 }
 0x2bf   :  { %v253_v56 = vpop.xlane.xlu0 %252 }
 0x2c0   :  { %v265_v58 = vsub.f32 %v223_v41, %v253_v56  ;;  %v1036_v41 = vld [vmem:[%s1117_s3] sm:$0x3f]  }
 0x2c2   :  { %v270_v59 = vpack.c.bf16 %v265_v58, %v264_v57 }
 0x2c3   :  { %v244_v60 = vpop.xlane.xlu0 %243 }
 0x2c4   :  { %v279_v61 = vmul.bf16 1069105081, %v270_v59  ;;  %v262_v63 = vsub.f32 %v813_v31, %v244_v60 }
 0x2c6   :  { %884 = vpow.bf16 %v279_v61 }
 0x2c7   :  { %v247_v62 = vpop.xlane.xlu0 %246 }
 0x2c8   :  { %v263_v2 = vsub.f32 %v814_v33, %v247_v62 }
 0x2ca   :  { %v269_v3 = vpack.c.bf16 %v263_v2, %v262_v63 }
 0x2cb   :  { %v238_v5 = vpop.xlane.xlu0 %237 }
 0x2cc   :  { %v883_v6 = vpop.eup %882  ;;  %v276_v8 = vmul.bf16 1069105081, %v269_v3  ;;  %v260_v13 = vsub.f32 %v204_v32, %v238_v5  ;;  %v1015_v32 = vshrl.u32 %v341_v29, 7 }
 0x2cd   :  { %v298_v11 = vsel %vm235_vm4, %v883_v6, 0 }
 0x2ce   :  { %886 = vpow.bf16 %v276_v8  ;;  %820 = vmatpush3.bf16.xpose.msra.mxu0 %v298_v11  ;;  %v343_v33 = vsub.s32 6, %v1015_v32 }
 0x2cf   :  { %v241_v12 = vpop.xlane.xlu0 %240  ;;  %821 = vmatprep.subr.bf16.mxu0 %v903_v47 }
 0x2d0   :  { %v261_v15 = vsub.f32 %v207_v34, %v241_v12 }
 0x2d2   :  { %v268_v16 = vpack.c.bf16 %v261_v15, %v260_v13 }
 0x2d4   :  { %v885_v17 = vpop.eup %884  ;;  %v273_v18 = vmul.bf16 1069105081, %v268_v16 }
 0x2d5   :  { %v295_v19 = vsel %vm235_vm4, %v885_v17, 0 }
 0x2d6   :  { %888 = vpow.bf16 %v273_v18  ;;  %822 = vmatpush3.bf16.xpose.msra.mxu0 %v295_v19 }
 0x2d7   :  { %823 = vmatprep.subr.bf16.mxu0 %v903_v47  ;;  %v1006_v23 = vpop.permute.xlu0 %46 }
 0x2d8   :  { %v111_v25 = vadd.f32 %v971_v10, %v1006_v23 }
 0x2da   :  { %v284_v26 = vpack.c.bf16 %v111_v25, %v111_v25  ;;  %v30_v25 = vld [vmem:[%s1118_s4 + $0x8] sm:$0xf] }
 0x2dc   :  { %v887_v20 = vpop.eup %886 }
 0x2dd   :  { %v292_v21 = vsel %vm235_vm4, %v887_v20, 0 }
 0x2de   :  { %824 = vmatpush3.bf16.xpose.msra.mxu0 %v292_v21 }
 0x2df   :  { %825 = vmatprep.subr.bf16.mxu0 %v903_v47 }
 0x2e4   :  { %v889_v22 = vpop.eup %888 }
 0x2e5   :  { %v289_v24 = vsel %vm235_vm4, %v889_v22, 0 }
 0x2e6   :  { %826 = vmatpush3.bf16.xpose.msra.mxu0 %v289_v24  ;;  %v29_v24 = vld [vmem:[%s1118_s4] sm:$0xff] }
 0x2e7   :  { %853 = vmatprep.subr.bf16.mxu0 %v903_v47 }
 0x2ed   :  { %828 = vmatmul.mubr.msk.bf16.vlgmr.msra.gmra.mxu0 %vm235_vm4, %v284_v26 }
 0x2ee   :  { %861 = vmatprep.mubr.msk.bf16.mxu0 %vm904_vm5, %v903_v47 }
 0x3ad   :  { %v334_v27 = vpop.f32.mrf.mxu0 }
 0x3ae   :  { %890 = vrcp.f32 %v334_v27 }
 0x3af   :  { %v829_v28 = vpop.f32.mrf.mxu0 }
 0x3b1   :  { %v337_v30 = vpop.f32.mrf.mxu0 }
 0x3b3   :  { %v830_v31 = vpop.f32.mrf.mxu0 }
 0x3bb   :  { %v891_v34 = vpop.eup %890 }
 0x3bc   :  { %v344_v10 = vrot.slane %v891_v34, %v343_v33 }
 0x3be   :  { %v345_v37 = vmul.f32 %v344_v10, %v334_v27 }
 0x3c0   :  { %v346_v38 = vpack.c.bf16 %v345_v37, %v345_v37 }
 0x3c2   :  { %v366_v40 = vsel %vm166_vm2, %v346_v38, 0 }
 0x3c3   :  { %832 = vmatpush3.bf16.msra.mxu1 %v366_v40 }
 0x3c4   :  { %873 = vmatprep.subr.msk.bf16.mxu1 %vm64_vm0, %v417_v39 }
 0x3c6   :  { %834 = vmatmul.mubr.msk.bf16.vlgmr.msra.gmra.mxu1 %vm153_vm3, %v1036_v41 }
 0x3c7   :  { %838 = vmatpush3.bf16.msra.mxu1 %v419_v42  ;;  %839 = vmatprep.mubr.msk.bf16.mxu1 %vm57_vm1, %v950_v4 }
 0x3ce   :  { %840 = vmatmul.mubr.msk.bf16.vlgmr.msra.gmra.mxu1 %vm57_vm1, %v960_v7 }
 0x486   :  { %v1046_v43 = vpop.f32.mrf.mxu1 }
 0x488   :  { %v835_v44 = vpop.f32.mrf.mxu1 }
 0x48a   :  { %v1048_v45 = vpop.f32.mrf.mxu1 }
 0x48c   :  { %v836_v46 = vpop.f32.mrf.mxu1 }
 0x48e   :  { %v1050_v48 = vpop.f32.mrf.mxu1 }
 0x490   :  { %v455_v49 = vpop.f32.mrf.mxu1 }
 0x491   :  { %v456_v50 = vadd.f32 %v455_v49, %v969_v9 }
 0x492   :  { %v842_v51 = vpop.f32.mrf.mxu1 }
 0x493   :  { %469 = vxpose.xlu1.b32.start.end [1/1] (short) (narrow) %v456_v50, 64 }
 0x494   :  { %v458_v52 = vpop.f32.mrf.mxu1 }
 0x495   :  { %v459_v53 = vadd.f32 %v458_v52, %v974_v14 }
 0x497   :  { %v505_v4 = vpack.c.bf16 %v459_v53, %v459_v53 }
 0x499   :  { %v519_v54 = vsel %vm166_vm2, %v505_v4, 0  ;;  %874 = vmatprep.subr.msk.bf16.mxu1 %vm166_vm2, %v505_v4 }
 0x49a   :  { %844 = vmatpush3.bf16.msra.mxu1 %v519_v54 }
 0x49b   :  { %865 = vmatprep.subr.bf16.mxu1 %v903_v47 }
 0x50f   :  { %v485_v7 = vpop.trf.xlu1 }
 0x513   :  { %v486_v55 = vpop.trf.xlu1 }
 0x514   :  { %v501_v56 = vpack.c.bf16 %v486_v55, %v485_v7 }
 0x516   :  { %845 = vmatprep.mubr.msk.bf16.mxu1 %vm153_vm3, %v501_v56 }
 0x517   :  { %v487_v57 = vpop.trf.xlu1 }
 0x51b   :  { %v488_v9 = vpop.trf.xlu1 }
 0x51c   :  { %v502_v58 = vpack.c.bf16 %v488_v9, %v487_v57 }
 0x51e   :  { %846 = vmatmul.mubr.msk.bf16.vlgmr.msra.gmra.mxu1 %vm153_vm3, %v502_v58 }
 0x51f   :  { %v489_v59 = vpop.trf.xlu1 }
 0x523   :  { %v490_v14 = vpop.trf.xlu1 }
 0x524   :  { %v503_v60 = vpack.c.bf16 %v490_v14, %v489_v59 }
 0x526   :  { %849 = vmatprep.mubr.msk.bf16.mxu1 %vm153_vm3, %v503_v60 }
 0x527   :  { %v491_v61 = vpop.trf.xlu1 }
 0x52b   :  { %v492_v62 = vpop.trf.xlu1 }
 0x52c   :  { %v504_v63 = vpack.c.bf16 %v492_v62, %v491_v61 }
 0x52e   :  { %850 = vmatmul.mubr.msk.bf16.gmra.mxu1 %vm153_vm3, %v504_v63 }
 0x52f   :  { %867 = vmatprep.mubr.msk.bf16.mxu1 %vm904_vm5, %v903_v47 }
 0x5de   :  { %v847_v2 = vpop.f32.mrf.mxu1 }
 0x5df   :  { %v592_v19 = vsel %vm235_vm4, %v847_v2, -inf }
 0x5e0   :  { %v555_v3 = vpop.f32.mrf.mxu1 }
 0x5e1   :  { %v586_v21 = vsel %vm235_vm4, %v555_v3, -inf }
 0x5e2   :  { %v848_v5 = vpop.f32.mrf.mxu1 }
 0x5e3   :  { %v595_v20 = vsel %vm235_vm4, %v848_v5, -inf }
 0x5e4   :  { %v558_v6 = vpop.f32.mrf.mxu1 }
 0x5e5   :  { %v589_v22 = vsel %vm235_vm4, %v558_v6, -inf }
 0x5ee   :  { %v851_v8 = vpop.f32.mrf.mxu1 }
 0x5ef   :  { %v604_v11 = vsel %vm235_vm4, %v851_v8, -inf }
 0x5f0   :  { %605 = vmax.xlane.f32.xlu0 %v604_v11  ;;  %v571_v12 = vpop.f32.mrf.mxu1 }
 0x5f1   :  { %v598_v18 = vsel %vm235_vm4, %v571_v12, -inf }
 0x5f2   :  { %v852_v13 = vpop.f32.mrf.mxu1 }
 0x5f3   :  { %v607_v15 = vsel %vm235_vm4, %v852_v13, -inf }
 0x5f4   :  { %608 = vmax.xlane.f32.xlu0 %v607_v15  ;;  %v574_v16 = vpop.f32.mrf.mxu1 }
 0x5f5   :  { %v601_v17 = vsel %vm235_vm4, %v574_v16, -inf }
 0x5f6   :  { %602 = vmax.xlane.f32.xlu1 %v601_v17 }
 0x5f8   :  { %599 = vmax.xlane.f32.xlu0 %v598_v18 }
 0x5fc   :  { %593 = vmax.xlane.f32.xlu0 %v592_v19 }
 0x600   :  { %596 = vmax.xlane.f32.xlu0 %v595_v20 }
 0x604   :  { %587 = vmax.xlane.f32.xlu0 %v586_v21 }
 0x608   :  { %590 = vmax.xlane.f32.xlu0 %v589_v22 }
 0x61e   :  { %349 = vperm.xlu0 %878, %v29_v24  }
 0x622   :  { %354 = vperm.xlu0 %878, %v30_v25  }
 0x679   :  { %v606_v26 = vpop.xlane.xlu0 %605 }
 0x67a   :  { %v616_v28 = vsub.f32 %v851_v8, %v606_v26 }
 0x67d   :  { %v609_v27 = vpop.xlane.xlu0 %608 }
 0x67e   :  { %v617_v29 = vsub.f32 %v852_v13, %v609_v27 }
 0x67f   :  { %v603_v30 = vpop.xlane.xlu1 %602 }
 0x680   :  { %v621_v31 = vpack.c.bf16 %v617_v29, %v616_v28  ;;  %v615_v37 = vsub.f32 %v574_v16, %v603_v30 }
 0x681   :  { %v600_v34 = vpop.xlane.xlu0 %599 }
 0x682   :  { %v632_v10 = vmul.bf16 1069105081, %v621_v31  ;;  %v614_v38 = vsub.f32 %v571_v12, %v600_v34 }
 0x684   :  { %892 = vpow.bf16 %v632_v10  ;;  %v620_v39 = vpack.c.bf16 %v615_v37, %v614_v38 }
 0x685   :  { %v594_v40 = vpop.xlane.xlu0 %593 }
 0x686   :  { %v629_v42 = vmul.bf16 1069105081, %v620_v39  ;;  %v612_v46 = vsub.f32 %v847_v2, %v594_v40 }
 0x688   :  { %894 = vpow.bf16 %v629_v42 }
 0x689   :  { %v597_v44 = vpop.xlane.xlu0 %596 }
 0x68a   :  { %v613_v49 = vsub.f32 %v848_v5, %v597_v44 }
 0x68c   :  { %v619_v50 = vpack.c.bf16 %v613_v49, %v612_v46 }
 0x68d   :  { %v588_v51 = vpop.xlane.xlu0 %587 }
 0x68e   :  { %v626_v52 = vmul.bf16 1069105081, %v619_v50  ;;  %v610_v54 = vsub.f32 %v555_v3, %v588_v51 }
 0x690   :  { %896 = vpow.bf16 %v626_v52 }
 0x691   :  { %v591_v53 = vpop.xlane.xlu0 %590 }
 0x692   :  { %v893_v4 = vpop.eup %892  ;;  %v611_v7 = vsub.f32 %v558_v6, %v591_v53 }
 0x693   :  { %v648_v55 = vsel %vm235_vm4, %v893_v4, 0 }
 0x694   :  { %v618_v56 = vpack.c.bf16 %v611_v7, %v610_v54  ;;  %854 = vmatpush3.bf16.xpose.msra.mxu0 %v648_v55 }
 0x695   :  { %855 = vmatprep.subr.bf16.mxu0 %v903_v47 }
 0x696   :  { %v623_v57 = vmul.bf16 1069105081, %v618_v56  ;;  %v895_v9 = vpop.eup %894 }
 0x697   :  { %v645_v14 = vsel %vm235_vm4, %v895_v9, 0 }
 0x698   :  { %898 = vpow.bf16 %v623_v57 }
 0x699   :  { %v350_v58 = vpop.permute.xlu0 %349 }
 0x69a   :  { %v403_v59 = vadd.f32 %v1046_v43, %v350_v58 }
 0x69c   :  { %v409_v60 = vadd.f32 %v403_v59, %v938_v0  ;;  %856 = vmatpush3.bf16.xpose.msra.mxu0 %v645_v14 }
 0x69d   :  { %v355_v61 = vpop.permute.xlu0 %354  ;;  %857 = vmatprep.subr.bf16.mxu0 %v903_v47 }
 0x69e   :  { %411 = vst.msk [vmem:[%s1119_s5] sm:$0xff] %vm235_vm4, %v409_v60  ;;  %v406_v62 = vadd.f32 %v1048_v45, %v355_v61  ;;  %v897_v63 = vpop.eup %896  ;;  %v464_v45 = vadd.f32 %v1050_v48, %v1006_v23 }
 0x69f   :  { %v642_v0 = vsel %vm235_vm4, %v897_v63, 0 }
 0x6a0   :  { %v410_v2 = vadd.f32 %v406_v62, %v943_v1  ;;  %v634_v5 = vpack.c.bf16 %v464_v45, %v464_v45 }
 0x6a2   :  { %413 = vst.msk [vmem:[%s1119_s5 + $0x8] sm:$0xf] %vm412_vm6, %v410_v2 }
 0x6a4   :  { %858 = vmatpush3.bf16.xpose.msra.mxu0 %v642_v0 }
 0x6a5   :  { %859 = vmatprep.subr.bf16.mxu0 %v903_v47 }
 0x6a6   :  { %v899_v43 = vpop.eup %898 }
 0x6a7   :  { %v639_v3 = vsel %vm235_vm4, %v899_v43, 0 }
 0x6ac   :  { %860 = vmatpush3.bf16.xpose.msra.mxu0 %v639_v3 }
 0x6b3   :  { %862 = vmatmul.mubr.msk.bf16.vlgmr.msra.gmra.mxu0 %vm235_vm4, %v634_v5 }
 0x773   :  { %v684_v1 = vpop.f32.mrf.mxu0 }
 0x774   :  { %900 = vrcp.f32 %v684_v1 }
 0x775   :  { %v863_v6 = vpop.f32.mrf.mxu0 }
 0x777   :  { %v687_v8 = vpop.f32.mrf.mxu0 }
 0x779   :  { %v864_v11 = vpop.f32.mrf.mxu0 }
 0x781   :  { %v901_v12 = vpop.eup %900 }
 0x782   :  { %v694_v13 = vrot.slane %v901_v12, %v343_v33 }
 0x784   :  { %v695_v47 = vmul.f32 %v694_v13, %v684_v1 }
 0x786   :  { %v696_v15 = vpack.c.bf16 %v695_v47, %v695_v47 }
 0x788   :  { %v698_v16 = vsel %vm166_vm2, %v696_v15, 0 }
 0x789   :  { %866 = vmatpush3.bf16.msra.mxu1 %v698_v16 }
 0x78c   :  { %868 = vmatmul.mubr.msk.bf16.vlgmr.msra.gmra.mxu1 %vm153_vm3, %v1036_v41 }
 0x84c   :  { %v734_v23 = vpop.f32.mrf.mxu1 }
 0x84d   :  { %v735_v48 = vadd.f32 %v734_v23, %v350_v58 }
 0x84e   :  { %v869_v17 = vpop.f32.mrf.mxu1 }
 0x84f   :  { %v741_v18 = vadd.f32 %v1023_v35, %v735_v48 }
 0x850   :  { %v737_v19 = vpop.f32.mrf.mxu1 }
 0x851   :  { %771 = vst.msk [vmem:[%s1119_s5 + $0x10] sm:$0xff] %vm235_vm4, %v741_v18  ;;  %v738_v32 = vadd.f32 %v737_v19, %v355_v61 }
 0x852   :  { %v870_v33 = vpop.f32.mrf.mxu1 }
 0x853   :  { %v742_v20 = vadd.f32 %v1028_v36, %v738_v32 }
 0x855   :  { %772 = vst.msk [vmem:[%s1119_s5 + $0x18] sm:$0xf] %vm412_vm6, %v742_v20 }

</bundles_post_ra>
